<compile_context>
chip_gen: v7x
topology: tpu7x:2x2x1
jax: 0.10.0
libtpu: 0.0.40
codegen_flags: <defaults>
</compile_context>

<pallas_src>
import functools

import jax
import jax.numpy as jnp
from jax.experimental import pallas as pl
from jax.experimental.pallas import tpu as pltpu


def _se_kernel(x_ref, wd_ref, bd_ref, wu_ref, bu_ref, o_ref, *, inv_hw):
    # x_ref : (1, C, HWp)   input tile (HWp = H*W padded to multiple of 128)
    # wd_ref: (C, I)        down 1x1 conv weight (transposed)
    # bd_ref: (1, I)        down bias
    # wu_ref: (I, C)        up 1x1 conv weight (transposed)
    # bu_ref: (1, C)        up bias
    # o_ref : (1, C, HWp)

    # Global average pool over spatial.  Padding lanes are zero, so a plain
    # lane-sum scaled by 1/(H*W) is exact.  The f32 cast is fused into the
    # reduction — no full-precision copy of the whole tile is materialized.
    pooled = jnp.sum(x_ref[...].astype(jnp.float32), axis=-1) * inv_hw   # (1, C)

    # down: 1x1 conv == matmul, + bias, ReLU (all f32, tiny)
    hidden = jnp.dot(pooled, wd_ref[...],
                     preferred_element_type=jnp.float32) + bd_ref[...]  # (1, I)
    hidden = jnp.maximum(hidden, 0.0)

    # up: 1x1 conv == matmul, + bias, sigmoid
    logits = jnp.dot(hidden, wu_ref[...],
                     preferred_element_type=jnp.float32) + bu_ref[...]  # (1, C)
    scale = 1.0 / (1.0 + jnp.exp(-logits))                              # (1, C)

    # Excite: per-channel scale of the input, computed in the input dtype
    # (only the tiny (1, C, 1) scale gets cast, not the big tile).
    o_ref[...] = x_ref[...] * scale.astype(o_ref.dtype)[:, :, None]


def se_block(x, w_down, b_down, w_up, b_up):
    """x: (N, C, H, W); w_down: (I, C, 1, 1); b_down: (I,);
       w_up: (C, I, 1, 1); b_up: (C,).  Assumes H == W (like the reference)."""
    N, C, H, W = x.shape
    I = w_down.shape[0]
    HW = H * W
    # Keep the output last dim lane-dense: pad flattened spatial to a
    # multiple of 128 so stores are unmasked vst (not vst.msk partials).
    HW_pad = ((HW + 127) // 128) * 128

    x_flat = x.reshape(N, C, HW)
    if HW_pad != HW:
        x_flat = jnp.pad(x_flat, ((0, 0), (0, 0), (0, HW_pad - HW)))

    wd_t = w_down.reshape(I, C).T.astype(jnp.float32)   # (C, I): pooled @ wd_t
    wu_t = w_up.reshape(C, I).T.astype(jnp.float32)     # (I, C): hidden @ wu_t
    bd2 = b_down.reshape(1, I).astype(jnp.float32)
    bu2 = b_up.reshape(1, C).astype(jnp.float32)

    # VMEM budget: in + out tiles double-buffered, plus the tiny weights.
    # Clamp to [16 MiB, 48 MiB] so it is safe on every generation
    # (v5e scoped default is 16 MiB; v7x physical VMEM is 64 MiB per TC).
    tile_bytes = C * HW_pad * x.dtype.itemsize
    needed = 4 * tile_bytes + 2 * 4 * (2 * I * C + I + C) + (2 << 20)
    vmem_limit = int(min(max(needed, 16 * 1024 * 1024), 48 * 1024 * 1024))

    kernel = functools.partial(_se_kernel, inv_hw=1.0 / HW)

    out_flat = pl.pallas_call(
        kernel,
        out_shape=jax.ShapeDtypeStruct((N, C, HW_pad), x.dtype),
        grid_spec=pltpu.PrefetchScalarGridSpec(
            num_scalar_prefetch=0,
            grid=(N,),
            in_specs=[
                pl.BlockSpec((1, C, HW_pad), lambda n: (n, 0, 0)),  # per-image tile
                pl.BlockSpec((C, I), lambda n: (0, 0)),             # weights (full)
                pl.BlockSpec((1, I), lambda n: (0, 0)),
                pl.BlockSpec((I, C), lambda n: (0, 0)),
                pl.BlockSpec((1, C), lambda n: (0, 0)),
            ],
            out_specs=pl.BlockSpec((1, C, HW_pad), lambda n: (n, 0, 0)),
        ),
        compiler_params=pltpu.CompilerParams(
            dimension_semantics=("parallel",),   # shards N across TCs on v7x
            vmem_limit_bytes=vmem_limit,
        ),
    )(x_flat, wd_t, bd2, wu_t, bu2)

    if HW_pad != HW:
        out_flat = out_flat[:, :, :HW]
    return out_flat.reshape(N, C, H, W)


def se_block_ref(x, w_down, b_down, w_up, b_up):
    """Pure-JAX reference mirroring the PyTorch forward (assumes H == W)."""
    N, C, H, W = x.shape
    I = w_down.shape[0]
    pooled = jnp.mean(x, axis=(2, 3))                                  # (N, C)
    hidden = jnp.maximum(pooled @ w_down.reshape(I, C).T + b_down, 0.0)
    scale = jax.nn.sigmoid(hidden @ w_up.reshape(C, I).T + b_up)
    return x * scale[:, :, None, None]


if __name__ == "__main__":
    key = jax.random.PRNGKey(0)
    k_x, k_wd, k_bd, k_wu, k_bu = jax.random.split(key, 5)

    N, C, I, H, W = 2, 4, 8, 16, 16   # input_channels=4, internal_neurons=8

    x = jax.random.normal(k_x, (N, C, H, W), dtype=jnp.float32)
    w_down = jax.random.normal(k_wd, (I, C, 1, 1), dtype=jnp.float32) * 0.1
    b_down = jax.random.normal(k_bd, (I,), dtype=jnp.float32) * 0.1
    w_up = jax.random.normal(k_wu, (C, I, 1, 1), dtype=jnp.float32) * 0.1
    b_up = jax.random.normal(k_bu, (C,), dtype=jnp.float32) * 0.1

    out = se_block(x, w_down, b_down, w_up, b_up)
    jax.block_until_ready(out)

    ref = se_block_ref(x, w_down, b_down, w_up, b_up)
    assert out.shape == ref.shape
    assert jnp.allclose(out, ref, atol=1e-5, rtol=1e-5), "mismatch vs reference"

    print("KERNEL_OK")
</pallas_src>

<mosaic_0001>
module attributes {stable_mosaic.version = 11 : i64} {
  func.func @_se_kernel(%arg0: i32, %arg1: memref<1x4x256xf32, #tpu.memory_space<vmem>>, %arg2: memref<4x8xf32, #tpu.memory_space<vmem>>, %arg3: memref<1x8xf32, #tpu.memory_space<vmem>>, %arg4: memref<8x4xf32, #tpu.memory_space<vmem>>, %arg5: memref<1x4xf32, #tpu.memory_space<vmem>>, %arg6: memref<1x4x256xf32, #tpu.memory_space<vmem>>) attributes {dimension_semantics = [#tpu.dimension_semantics<parallel>], iteration_bounds = array<i64: 2>, scalar_prefetch = 0 : i64, scratch_operands = 0 : i64, tpu.core_type = #tpu.core_type<tc>, window_params = [{transform_indices = @transform_0, window_bounds = array<i64: 1, 4, 256>}, {pipeline_mode = #tpu.pipeline_mode<synchronous>, transform_indices = @transform_1, window_bounds = array<i64: 4, 8>}, {pipeline_mode = #tpu.pipeline_mode<synchronous>, transform_indices = @transform_2, window_bounds = array<i64: 1, 8>}, {pipeline_mode = #tpu.pipeline_mode<synchronous>, transform_indices = @transform_3, window_bounds = array<i64: 8, 4>}, {pipeline_mode = #tpu.pipeline_mode<synchronous>, transform_indices = @transform_4, window_bounds = array<i64: 1, 4>}, {transform_indices = @transform_5, window_bounds = array<i64: 1, 4, 256>}]} {
    %c0 = arith.constant 0 : index
    %c0_0 = arith.constant 0 : index
    %c0_1 = arith.constant 0 : index
    %0 = vector.load %arg1[%c0, %c0_0, %c0_1] : memref<1x4x256xf32, #tpu.memory_space<vmem>>, vector<1x4x256xf32>
    %cst = arith.constant dense<0.000000e+00> : vector<1x4xf32>
    %1 = vector.multi_reduction <add>, %0, %cst [2] : vector<1x4x256xf32> to vector<1x4xf32>
    %cst_2 = arith.constant 3.906250e-03 : f32
    %2 = vector.broadcast %cst_2 : f32 to vector<1x4xf32>
    %3 = arith.mulf %1, %2 : vector<1x4xf32>
    %c0_3 = arith.constant 0 : index
    %c0_4 = arith.constant 0 : index
    %4 = vector.load %arg2[%c0_3, %c0_4] : memref<4x8xf32, #tpu.memory_space<vmem>>, vector<4x8xf32>
    %cst_5 = arith.constant dense<0.000000e+00> : vector<1x8xf32>
    %5 = tpu.matmul %3, %4, %cst_5 {dimension_numbers = #tpu.dot_dimension_numbers<[1], [0], [0], [1], [0, 0, 1, 1], [], []>} : vector<1x4xf32>, vector<4x8xf32>, vector<1x8xf32> -> vector<1x8xf32>
    %c0_6 = arith.constant 0 : index
    %c0_7 = arith.constant 0 : index
    %6 = vector.load %arg3[%c0_6, %c0_7] : memref<1x8xf32, #tpu.memory_space<vmem>>, vector<1x8xf32>
    %7 = arith.addf %5, %6 : vector<1x8xf32>
    %cst_8 = arith.constant 0.000000e+00 : f32
    %8 = vector.broadcast %cst_8 : f32 to vector<1x8xf32>
    %9 = arith.maximumf %7, %8 : vector<1x8xf32>
    %c0_9 = arith.constant 0 : index
    %c0_10 = arith.constant 0 : index
    %10 = vector.load %arg4[%c0_9, %c0_10] : memref<8x4xf32, #tpu.memory_space<vmem>>, vector<8x4xf32>
    %cst_11 = arith.constant dense<0.000000e+00> : vector<1x4xf32>
    %11 = tpu.matmul %9, %10, %cst_11 {dimension_numbers = #tpu.dot_dimension_numbers<[1], [0], [0], [1], [0, 0, 1, 1], [], []>} : vector<1x8xf32>, vector<8x4xf32>, vector<1x4xf32> -> vector<1x4xf32>
    %c0_12 = arith.constant 0 : index
    %c0_13 = arith.constant 0 : index
    %12 = vector.load %arg5[%c0_12, %c0_13] : memref<1x4xf32, #tpu.memory_space<vmem>>, vector<1x4xf32>
    %13 = arith.addf %11, %12 : vector<1x4xf32>
    %cst_14 = arith.constant 0.000000e+00 : f32
    %14 = vector.broadcast %cst_14 : f32 to vector<1x4xf32>
    %15 = arith.subf %14, %13 : vector<1x4xf32>
    %16 = math.exp %15 : vector<1x4xf32>
    %cst_15 = arith.constant 1.000000e+00 : f32
    %17 = vector.broadcast %cst_15 : f32 to vector<1x4xf32>
    %18 = arith.addf %17, %16 : vector<1x4xf32>
    %cst_16 = arith.constant 1.000000e+00 : f32
    %19 = vector.broadcast %cst_16 : f32 to vector<1x4xf32>
    %20 = arith.divf %19, %18 : vector<1x4xf32>
    %c0_17 = arith.constant 0 : index
    %c0_18 = arith.constant 0 : index
    %c0_19 = arith.constant 0 : index
    %21 = vector.load %arg1[%c0_17, %c0_18, %c0_19] : memref<1x4x256xf32, #tpu.memory_space<vmem>>, vector<1x4x256xf32>
    %22 = vector.shape_cast %20 : vector<1x4xf32> to vector<1x4x1xf32>
    %23 = vector.broadcast %22 : vector<1x4x1xf32> to vector<1x4x256xf32>
    %24 = arith.mulf %21, %23 : vector<1x4x256xf32>
    %c0_20 = arith.constant 0 : index
    %c0_21 = arith.constant 0 : index
    %c0_22 = arith.constant 0 : index
    %25 = vector.load %arg6[%c0_20, %c0_21, %c0_22] : memref<1x4x256xf32, #tpu.memory_space<vmem>>, vector<1x4x256xf32>
    tpu.vector_store %arg6[%c0_20, %c0_21, %c0_22], %24 {strides = array<i32>} : memref<1x4x256xf32, #tpu.memory_space<vmem>>, vector<1x4x256xf32>,
    return
  }
  func.func @transform_0(%arg0: i32) -> (i32, i32, i32) {
    %c0_i32 = arith.constant 0 : i32
    %c0_i32_0 = arith.constant 0 : i32
    %c0_i32_1 = arith.constant 0 : i32
    return %arg0, %c0_i32, %c0_i32_0 : i32, i32, i32
  }
  func.func @transform_1(%arg0: i32) -> (i32, i32) {
    %c0_i32 = arith.constant 0 : i32
    %c0_i32_0 = arith.constant 0 : i32
    %c0_i32_1 = arith.constant 0 : i32
    return %c0_i32, %c0_i32_0 : i32, i32
  }
  func.func @transform_2(%arg0: i32) -> (i32, i32) {
    %c0_i32 = arith.constant 0 : i32
    %c0_i32_0 = arith.constant 0 : i32
    %c0_i32_1 = arith.constant 0 : i32
    return %c0_i32, %c0_i32_0 : i32, i32
  }
  func.func @transform_3(%arg0: i32) -> (i32, i32) {
    %c0_i32 = arith.constant 0 : i32
    %c0_i32_0 = arith.constant 0 : i32
    %c0_i32_1 = arith.constant 0 : i32
    return %c0_i32, %c0_i32_0 : i32, i32
  }
  func.func @transform_4(%arg0: i32) -> (i32, i32) {
    %c0_i32 = arith.constant 0 : i32
    %c0_i32_0 = arith.constant 0 : i32
    %c0_i32_1 = arith.constant 0 : i32
    return %c0_i32, %c0_i32_0 : i32, i32
  }
  func.func @transform_5(%arg0: i32) -> (i32, i32, i32) {
    %c0_i32 = arith.constant 0 : i32
    %c0_i32_0 = arith.constant 0 : i32
    %c0_i32_1 = arith.constant 0 : i32
    return %arg0, %c0_i32, %c0_i32_0 : i32, i32, i32
  }
}

</mosaic_0001>

<bundles_post_ra>
// kernel: tpu_custom_call.1
= control target key start
LH: loop header
LB: loop body
LE: loop exit
PB: predicated region body
PF: predicated region fallthrough
CT: control target
= control target key end

     0   :  { %10 = vsyncpa [#allocation3], 0  ;;  %s920_s0 = inlined_call_operand.hbm [shape: f32[2,4,256], index: 0, kind: input, shape index: {}]   ;;  %s921_s1 = inlined_call_operand.vmem [shape: f32[4,8], index: 1, kind: input, shape index: {}]   ;;  %s922_s2 = inlined_call_operand.vmem [shape: f32[1,8], index: 2, kind: input, shape index: {}]   ;;  %s923_s3 = inlined_call_operand.vmem [shape: f32[8,4], index: 3, kind: input, shape index: {}]   ;;  %s924_s4 = inlined_call_operand.vmem [shape: f32[1,4], index: 4, kind: input, shape index: {}]   ;;  %s925_s5 = inlined_call_operand.hbm [shape: f32[2,4,256], index: 5, kind: output, shape index: {}]  }
   0x1   :  { %12 = vsyncpa [#allocation3 + $0x1], 0 }
   0x2   :  { %13 = vsyncpa [#allocation4], 0 }
   0x3   :  { %15 = vsyncpa [#allocation4 + $0x1], 0  ;;  %s743_s18 = smov 0   ;;  %s745_s19 = smov 0  }
   0x4   :  { %s747_s20 = smov 0   ;;  %s749_s21 = smov 0  }
   0x5 LB: > { %s764_s22 = sadd.s32 4294967295, %s706_s21   ;;  %s523_s23 = sadd.s32 4294967294, %s706_s21   ;;  %s706_s21 = sphi %s749_s21, %s940_s21   ;;  %s702_s20 = sphi %s747_s20, %s939_s20   ;;  %s698_s19 = sphi %s745_s19, %s938_s19   ;;  %s694_s18 = sphi %s743_s18, %s937_s18  }
   0x6   : > { %s768_s24 = sadd.s32 1, %s706_s21   ;;  %s28_s25 = sadd.s32 1, %s702_s20 }
   0x7   : > { %s25_s26 = ssub.s32 %s706_s21, %s768_s24  ;;  %p35_p0 = scmp.ne.s32.totalorder %s702_s20, %s698_s19 }
   0x8   : > { %p26_p1 = scmp.eq.s32.totalorder %s25_s26, 0  ;;  %p36_p2 = scmp.eq.s32.totalorder %s706_s21, 0 }
   0x9   : > { %p41_p3 = scmp.ne.s32.totalorder %s698_s19, %s694_s18  ;;  %p42_p4 = scmp.eq.s32.totalorder %s764_s22, 0 }
   0xa   : > { %s780_s27 = scalar_select %p26_p1, %s702_s20, %s28_s25  }
   0xb   : > { %p782_p5 = por %p36_p2, %p35_p0  ;;  %p786_p6 = por %p42_p4, %p41_p3 }
   0xc   : > { %p149_p7 = scmp.eq.s32.totalorder %s764_s22, 1  ;;  %p155_p8 = scmp.eq.s32.totalorder %s523_s23, 1 }
   0xd   : > { %p568_p10 = scmp.lt.s32.totalorder %s706_s21, 2  ;;  %s187_s7 = sand.u32 1, %s702_s20  }
   0xe   : > { %p793_p11 = por %p149_p7, %p35_p0  ;;  %p797_p12 = por %p155_p8, %p41_p3 }
   0xf   : > { %s540_s8 = sshll.u32 %s706_s21, 7  ;;  %s526_s9 = sshll.u32 %s187_s7, 3 }
  0x10   : > { %s929_s30 = scalar_select %p793_p11, 1, 0 }
  0x11   : > { %s930_s6 = scalar_select %p797_p12, 1, 0 }
  0x12   : > { %s806_s12 = scalar_lea.hbm %s920_s0, %s540_s8  ;;  %s191_s13 = scalar_lea.vmem [#allocation2], %s526_s9 }
  0x13   : > { %s199_s14 = sshll.u32 %s191_s13, 4  ;;  %p810_p13 = pnand %p568_p10, %p782_p5  ;;  %s814_s14 = int_to_ptr.vmem [resolvable:$true] %s199_s14 }
  0x14   : > { %s188_s16 = scalar_lea.sflag [#allocation3], %s187_s7  ;;  %s610_s17 = scalar_lea.hbm %s806_s12, 128 }
  0x15   : > { %p611_p2 = scmp.ne.s32.totalorder %s806_s12, %s610_s17  ;;  %p612_p3 = pneg %p810_p13 }
  0x16   : > { %s615_s26 = scalar_lea.hbm %s920_s0, 256  ;;  %p616_p5 = scmp.lt.u32.totalorder %s806_s12, %s920_s0 }
  0x17   : > { %p613_p4 = pnand %p612_p3, %p611_p2  ;;  %p617_p8 = scmp.lt.u32.totalorder %s615_s26, %s610_s17 }
  0x18   : > { %p619_p9 = scmp.lt.u32.totalorder %s610_s17, %s806_s12 }
  0x19   : > { %p614_p7 = pneg %p613_p4  ;;  %p618_p10 = por %p617_p8, %p616_p5 }
  0x1b   : > { %p620_p0 = por %p619_p9, %p618_p10 }
  0x1d   : > { %p621_p1 = pnand %p620_p0, %p614_p7 }
  0x1f   : > { %624 = shalt.err (!%p621_p1)
}
  0x20   : > { %s625_s7 = scalar_lea.vmem %s814_s14, 128  ;;  %s708_s9 = smov [#allocation2]  }
  0x21   : > { %p626_p2 = scmp.ne.s32.totalorder %s814_s14, %s625_s7  ;;  %s630_s10 = sshll.u32 %s708_s9, 4  ;;  %s631_s10 = int_to_ptr.vmem [resolvable:$false] %s630_s10 }
  0x22   : > { %s632_s11 = scalar_lea.vmem %s631_s10, 256  ;;  %p633_p11 = scmp.lt.s32.totalorder %s814_s14, %s631_s10 }
  0x23   : > { %p628_p4 = pnand %p626_p2, %p612_p3  ;;  %p634_p5 = scmp.lt.s32.totalorder %s632_s11, %s625_s7 }
  0x25   : > { %p629_p12 = pneg %p628_p4  ;;  %p635_p8 = por %p634_p5, %p633_p11 }
  0x27   : > { %p636_p9 = pnand %p635_p8, %p629_p12 }
  0x29   : > { %639 = shalt.err (!%p636_p9)
}
  0x2a   : > { %563 = dma.hbm_to_vmem [thread:$0]  (!%p810_p13), %s806_s12, 128, %s814_s14, %s188_s16  }
  0x2b   : > { %p932_p0 = scmp.lt.s32.totalorder %s706_s21, 3  ;;  %p933_p1 = scmp.ge.s32.totalorder %s706_s21, 1 }
  0x2d   : > { %p205_p3 = pnand %p933_p1, %p932_p0 }
  0x2e   : > { %s848_s13 = sand.u32 (!%p205_p3), 1, %s698_s19  }
  0x2f   : > { %208 = sbr.rel (%p205_p3) target bundleno = 800 (0x320), region = 40  ;;  %s530_s17 = sshll.u32 (!%p205_p3), %s848_s13, 3 }
  0x30   : > { %s211_s23 = scalar_lea.sflag (!%p205_p3), [#allocation3], %s848_s13  ;;  %s214_s15 = scalar_lea.vmem (!%p205_p3), [#allocation2], %s530_s17 }
  0x36   : > { %685 = dma.done.wait (%p786_p6), %s211_s23, 128  }
  0x37   : > { %687 = vsyncadd (%p786_p6), %s211_s23, 4294967168  ;;  %vm245_vm0 = vcmask 1043456   ;;  %v241_v0 = vld [vmem:[%s214_s15] sm:$0xff]  ;;  %v709_v5 = vmov 0.0   ;;  %vm710_vm1 = vmmov 0   ;;  %v255_v7 = vlaneseq  ;;  %s541_s7 = sshll.u32 %s764_s22, 7 }
  0x38   : > { %v243_v1 = vcombine.high %v241_v0, %v241_v0  ;;  %v246_v2 = vsel %vm245_vm0, %v241_v0, 0.0  ;;  %546 = vmatprep.subr.mxu0 %v709_v5  ;;  %v252_v6 = vld [vmem:[%s921_s1] sm:$0xf]  ;;  %551 = vmatprep.subr.mxu1 %v709_v5  ;;  %vm261_vm2 = vcmask 31744   ;;  %vm340_vm3 = vcmask 64512   ;;  %s240_s9 = scalar_lea.vmem [#allocation5], %s530_s17  ;;  %s876_s15 = scalar_lea.hbm %s925_s5, %s541_s7 }
  0x39   : > { %547 = vmatpush3.msk.msra.mxu0 %vm245_vm0, %v252_v6  ;;  %548 = vmatprep.mubr.msk.f32.mxu0 %vm710_vm1, %v709_v5  ;;  %v256_v8 = vand.u32 127, %v255_v7  ;;  %v258_v9 = vshrl.u32 %v255_v7, 7  ;;  %v338_v14 = vld [vmem:[%s923_s3] sm:$0xff]  ;;  %v711_v31 = vmov 839922192   ;;  %s453_s10 = sshll.u32 %s240_s9, 4  ;;  %s878_s10 = int_to_ptr.vmem [resolvable:$true] %s453_s10 }
  0x3a   : > { %v247_v3 = vsel %vm245_vm0, %v243_v1, 0.0  ;;  %553 = vmatprep.mubr.msk.f32.mxu1 %vm710_vm1, %v709_v5  ;;  %552 = vmatpush3.msra.mxu1 %v338_v14  ;;  %v253_v15 = vld [vmem:[%s922_s2] sm:$0x1]  ;;  %v429_v32 = vunpack.c.l.s4 %v711_v31  ;;  %s439_s12 = scalar_lea.sflag [#allocation4], %s848_s13  ;;  %s640_s14 = scalar_lea.vmem %s878_s10, 128 }
  0x3b   : > { %v248_v4 = vadd.f32 %v247_v3, %v246_v2  ;;  %v259_v10 = vsub.s32 %v256_v8, %v258_v9  ;;  %v339_v20 = vld [vmem:[%s924_s4] sm:$0x1]  ;;  %v422_v28 = vsub.s32 0, %v258_v9  ;;  %p641_p6 = scmp.ne.s32.totalorder %s878_s10, %s640_s14  ;;  %p934_p11 = scmp.ne.s32.totalorder %s929_s30, 0 }
  0x3c   : > { %v430_v33 = vunpack.c.0.s8 %v429_v32  ;;  %s712_s22 = smov [#allocation5]  }
  0x3d   : > { %249 = vadd.xlane.f32.xlu0 %v248_v4  ;;  %p642_p12 = pnand %p641_p6, %p934_p11  ;;  %s644_s17 = sshll.u32 %s712_s22, 4  ;;  %s645_s17 = int_to_ptr.vmem [resolvable:$false] %s644_s17 }
  0x3e   : > { %v433_v34 = vsub.s32 %v430_v33, %v258_v9  ;;  %s646_s29 = scalar_lea.vmem %s645_s17, 256  ;;  %p647_p7 = scmp.lt.s32.totalorder %s878_s10, %s645_s17 }
  0x3f   : > { %p643_p13 = pneg %p642_p12  ;;  %p648_p10 = scmp.lt.s32.totalorder %s646_s29, %s640_s14 }
  0x41   : > { %p649_p2 = por %p648_p10, %p647_p7 }
  0x43   : > { %p650_p4 = pnand %p649_p2, %p643_p13 }
  0xca   : > { %v250_v11 = vpop.xlane.xlu0 %249 }
  0xcb   : > { %v251_v12 = vmul.f32 0.00390625, %v250_v11 }
  0xcd   : > { %v260_v13 = vrot.slane %v251_v12, %v259_v10 }
  0xcf   : > { %549 = vmatmul.mubr.msk.f32.vlgmr.msra.gmra.mrb[0].mxu0 %vm261_vm2, %v260_v13 }
 0x1a2   : > { %v333_v16 = vpop.f32.mrb[0].mxu0 }
 0x1a3   : > { %v334_v17 = vadd.f32 %v333_v16, %v253_v15  ;;  %v550_v18 = vpop.f32.mrb[1].mxu0 }
 0x1a5   : > { %v337_v19 = vmax.f32 %v334_v17, 0.0 }
 0x1a7   : > { %554 = vmatmul.mubr.msk.f32.vlgmr.msra.gmra.mrb[0].mxu1 %vm340_vm3, %v337_v19 }
 0x27a   : > { %v410_v21 = vpop.f32.mrb[0].mxu1 }
 0x27b   : > { %v411_v22 = vadd.f32 %v410_v21, %v339_v20  ;;  %v555_v23 = vpop.f32.mrb[1].mxu1 }
 0x27d   : > { %v414_v24 = vsub.f32 0.0, %v411_v22 }
 0x27f   : > { %v415_v25 = vmul.f32 1.442695, %v414_v24 }
 0x281   : > { %606 = vpow2.f32 %v415_v25 }
 0x28b   : > { %v607_v26 = vpop.eup %606 }
 0x28c   : > { %v417_v27 = vadd.f32 1.0, %v607_v26 }
 0x28e   : > { %608 = vrcp.f32 %v417_v27 }
 0x298   : > { %v609_v29 = vpop.eup %608 }
 0x299   : > { %v423_v30 = vrot.slane %v609_v29, %v422_v28 }
 0x29b   : > { %425 = vbcast.lane.b32.xlu0 %v423_v30, 256 }
 0x30d   : > { %v426_v35 = vpop.permute.xlu0 %425 }
 0x30e   : > { %v434_v36 = vrot.slane %v426_v35, %v433_v34 }
 0x310   : > { %v436_v37 = vmul.f32 %v434_v36, %v241_v0 }
 0x312   : > { %437 = vst [vmem:[%s240_s9] sm:$0xff] %v436_v37 }
 0x313   : > { %653 = shalt.err (!%p650_p4)
}
 0x314   : > { %s654_s13 = scalar_lea.hbm %s876_s15, 128  ;;  %s658_s26 = scalar_lea.hbm %s925_s5, 256 }
 0x315   : > { %p655_p5 = scmp.ne.s32.totalorder %s876_s15, %s654_s13  ;;  %p659_p0 = scmp.lt.u32.totalorder %s876_s15, %s925_s5 }
 0x316   : > { %p660_p1 = scmp.lt.u32.totalorder %s658_s26, %s654_s13  ;;  %p662_p6 = scmp.lt.u32.totalorder %s654_s13, %s876_s15 }
 0x317   : > { %p656_p8 = pnand %p655_p5, %p934_p11 }
 0x318   : > { %p661_p3 = por %p660_p1, %p659_p0 }
 0x319   : > { %p657_p9 = pneg %p656_p8 }
 0x31a   : > { %p663_p12 = por %p662_p6, %p661_p3 }
 0x31c   : > { %p664_p13 = pnand %p663_p12, %p657_p9 }
 0x31e   : > { %667 = shalt.err (!%p664_p13)
}
 0x31f   : > { %558 = dma.vmem_to_hbm [thread:$0]  (%p934_p11), %s878_s10, 128, %s876_s15, %s439_s12  }
 0x320 PF: > { %s465_s7 = sand.u32 1, %s694_s18   ;;  %p935_p7 = scmp.ne.s32.totalorder %s930_s6, 0 }
 0x321   : > { %p936_p10 = scmp.ge.s32.totalorder %s706_s21, 2  ;;  %s466_s9 = scalar_lea.sflag [#allocation4], %s465_s7 }
 0x323   : > { %p565_p2 = pnand %p936_p10, %p935_p7 }
 0x325   : > { %689 = dma.done.wait (!%p565_p2), %s466_s9, 128  }
 0x326   : > { %691 = vsyncadd (!%p565_p2), %s466_s9, 4294967168  ;;  %p18_p4 = scmp.ge.s32.totalorder %s768_s24, 4   ;;  %s937_s18 = smov %s698_s19 }
 0x327   : > { %s938_s19 = smov %s702_s20  ;;  %s939_s20 = smov %s780_s27 }
 0x328   : > { %s940_s21 = smov %s768_s24  ;;  %20 = sbr.rel (!%p18_p4) target bundleno = 5 (0x5), region = 85 }
 0x32f   :  { %471 = vsyncpa [#allocation3], 1 }
 0x330   :  { %473 = vsyncpa [#allocation3 + $0x1], 1 }
 0x331   :  { %474 = vsyncpa [#allocation4], 1 }
 0x332   :  { %476 = vsyncpa [#allocation4 + $0x1], 1 }

</bundles_post_ra>
